<compile_context>
chip_gen: v7x
topology: tpu7x:2x2x1
jax: 0.10.0
libtpu: 0.0.40
codegen_flags: <defaults>
</compile_context>

<pallas_src>
import functools

import jax
import jax.numpy as jnp
from jax.experimental import pallas as pl
from jax.experimental.pallas import tpu as pltpu


def _cdiv(a, b):
    return -(-a // b)


def _round_up(x, m):
    return _cdiv(x, m) * m


# ----------------------------------------------------------------------------
# Pallas kernel: one (E, tl) output tile = W_t @ patch-tile + bias.
# ----------------------------------------------------------------------------
def _patch_proj_kernel(x_ref, w_ref, b_ref, o_ref):
    # x_ref: (1, K, tl)   w_ref: (E, K)   b_ref: (E, 1) f32   o_ref: (1, E, tl)
    acc = jnp.dot(w_ref[...], x_ref[0], preferred_element_type=jnp.float32)
    o_ref[0] = (acc + b_ref[...]).astype(o_ref.dtype)


def _choose_tile_l(N, L, K, E, in_bytes, out_bytes, *, desired=8192,
                   vmem_budget=16 << 20):
    """Pick the L (lane) tile: large (amortize ~0.35us/step), lane-dense
    (multiple of 128, or == L for small unaligned L), within a padded-aware
    VMEM budget, and splitting L when N == 1 so both v7x cores get work."""
    sub_in = 16 if in_bytes == 2 else 8
    sub_out = 16 if out_bytes == 2 else 8

    def vmem_bytes(tl):
        tl_lane = _round_up(tl, 128)
        x_blk = _round_up(K, sub_in) * tl_lane * in_bytes       # (K, tl) block
        o_blk = _round_up(E, sub_out) * tl_lane * out_bytes     # (E, tl) block
        acc = _round_up(E, 8) * tl_lane * 4                     # f32 accumulator
        w_res = _round_up(E, sub_in) * _round_up(K, 128) * in_bytes
        b_res = _round_up(E, 8) * 128 * 4
        # input/output blocks double-buffered; resident weight/bias counted
        # double-buffered too (conservative).
        return 2 * (x_blk + o_blk) + acc + 2 * (w_res + b_res)

    def shrink(tl):
        while tl > 128 and vmem_bytes(tl) > vmem_budget:
            tl = max(128, (tl // 2 // 128) * 128)
        return tl

    if L % 128 == 0:
        tl = shrink(min(desired, L))
        # Guarantee >= 2 grid steps for v7x's two TensorCores when N == 1.
        if N == 1 and tl == L and L >= 256:
            tl = _round_up(_cdiv(L, 2), 128)
    else:
        if L <= desired and vmem_bytes(L) <= vmem_budget:
            tl = L          # single (lane-masked) tile per batch; fine for small L
        else:
            tl = shrink(min(desired, (L // 128) * 128))
    return tl


def _patch_proj(patches_t, w_t, b_col, out_dtype):
    """patches_t: (N, K, L), w_t: (E, K), b_col: (E, 1) f32 -> (N, E, L)."""
    N, K, L = patches_t.shape
    E = w_t.shape[0]
    in_bytes = jnp.dtype(patches_t.dtype).itemsize
    out_bytes = jnp.dtype(out_dtype).itemsize
    tl = _choose_tile_l(N, L, K, E, in_bytes, out_bytes)
    n_l = _cdiv(L, tl)   # last tile may be partial: OOB writes are dropped

    return pl.pallas_call(
        _patch_proj_kernel,
        out_shape=jax.ShapeDtypeStruct((N, E, L), out_dtype),
        grid_spec=pltpu.PrefetchScalarGridSpec(
            num_scalar_prefetch=0,
            grid=(N, n_l),
            in_specs=[
                pl.BlockSpec((1, K, tl), lambda n, i: (n, 0, i)),
                pl.BlockSpec((E, K), lambda n, i: (0, 0)),     # resident weight
                pl.BlockSpec((E, 1), lambda n, i: (0, 0)),     # resident bias
            ],
            out_specs=pl.BlockSpec((1, E, tl), lambda n, i: (n, 0, i)),
        ),
        compiler_params=pltpu.CompilerParams(
            dimension_semantics=("parallel", "parallel"),
            vmem_limit_bytes=32 << 20,   # explicit: v5e default is only 16 MiB
        ),
    )(patches_t, w_t, b_col)


# ----------------------------------------------------------------------------
# PatchEmbed3D forward (norm_layer=None path of the PyTorch module).
# ----------------------------------------------------------------------------
@functools.partial(jax.jit,
                   static_argnames=("patch_size", "compute_dtype", "out_dtype"))
def patch_embed_3d(x, conv_weight, conv_bias, *, patch_size,
                   compute_dtype=jnp.bfloat16, out_dtype=None):
    """
    x           : (N, C, D, H, W)
    conv_weight : (E, C, pt, ph, pw) — PyTorch Conv3d weight layout
    conv_bias   : (E,)
    returns     : (N, E, D', H', W') in `out_dtype` (defaults to compute_dtype)
    compute_dtype: dtype streamed through HBM/MXU (bf16 default; use
                   jnp.float32 for bit-close parity with the f32 conv).
                   Accumulation and bias add are always f32.
    """
    pt, ph, pw = patch_size
    N, C, D, H, W = x.shape
    if out_dtype is None:
        out_dtype = compute_dtype

    # Same padding semantics as the PyTorch forward (pad on the high side only).
    pad_d = (-D) % pt
    pad_h = (-H) % ph
    pad_w = (-W) % pw
    if pad_d or pad_h or pad_w:
        x = jnp.pad(x, ((0, 0), (0, 0), (0, pad_d), (0, pad_h), (0, pad_w)))
    D_, H_, W_ = D + pad_d, H + pad_h, W + pad_w
    Dp, Hp, Wp = D_ // pt, H_ // ph, W_ // pw

    E = conv_weight.shape[0]
    K = C * pt * ph * pw
    L = Dp * Hp * Wp

    # Rearrange video into the transposed patch matrix (N, K, L).  K order
    # (C, pt, ph, pw) matches the Conv3d weight contraction; L order
    # (Dp, Hp, Wp) matches the conv output spatial order, so the final
    # (N, E, L) -> (N, E, Dp, Hp, Wp) reshape is free (no transpose).
    # The pad + transpose + cast below fuse into a single XLA copy pass.
    # TODO(synk): move patch extraction into the kernel (read the raw video
    # slab per grid step) so the video is read from HBM exactly once.
    xp = x.reshape(N, C, Dp, pt, Hp, ph, Wp, pw)
    xp = xp.transpose(0, 1, 3, 5, 7, 2, 4, 6)        # (N, C, pt, ph, pw, Dp, Hp, Wp)
    patches_t = xp.reshape(N, K, L).astype(compute_dtype)

    w_t = conv_weight.reshape(E, K).astype(compute_dtype)   # (E, K)
    b_col = conv_bias.reshape(E, 1).astype(jnp.float32)     # (E, 1) f32

    out = _patch_proj(patches_t, w_t, b_col, out_dtype)     # (N, E, L)
    # TODO(synk): norm_layer branch not implemented (module default is None).
    return out.reshape(N, E, Dp, Hp, Wp)


# ----------------------------------------------------------------------------
# Reference (pure JAX) for correctness checking.
# ----------------------------------------------------------------------------
def patch_embed_3d_ref(x, conv_weight, conv_bias, patch_size):
    pt, ph, pw = patch_size
    N, C, D, H, W = x.shape
    pad_d, pad_h, pad_w = (-D) % pt, (-H) % ph, (-W) % pw
    x = jnp.pad(x, ((0, 0), (0, 0), (0, pad_d), (0, pad_h), (0, pad_w)))
    out = jax.lax.conv_general_dilated(
        x, conv_weight,
        window_strides=(pt, ph, pw),
        padding="VALID",
        dimension_numbers=("NCDHW", "OIDHW", "NCDHW"),
    )
    return out + conv_bias.reshape(1, -1, 1, 1, 1)


if __name__ == "__main__":
    key = jax.random.PRNGKey(0)
    k_w, k_b, k_x1, k_x2, k_x3 = jax.random.split(key, 5)

    # Module config (PatchEmbed3D defaults): patch_size=(2,4,4), in_chans=3,
    # embed_dim=192, norm_layer=None.
    patch_size = (2, 4, 4)
    in_chans = 3
    embed_dim = 192

    conv_weight = 0.05 * jax.random.normal(
        k_w, (embed_dim, in_chans) + patch_size, dtype=jnp.float32)
    conv_bias = 0.01 * jax.random.normal(k_b, (embed_dim,), dtype=jnp.float32)

    # --- Test 1: aligned video, f32 streaming (bit-close to the conv) -------
    N, D, H, W = 2, 8, 16, 16
    x1 = jax.random.normal(k_x1, (N, in_chans, D, H, W), dtype=jnp.float32)
    out1 = jax.block_until_ready(
        patch_embed_3d(x1, conv_weight, conv_bias, patch_size=patch_size,
                       compute_dtype=jnp.float32))
    ref1 = jax.block_until_ready(
        patch_embed_3d_ref(x1, conv_weight, conv_bias, patch_size))
    assert out1.shape == (N, embed_dim, D // 2, H // 4, W // 4), out1.shape
    assert out1.dtype == jnp.float32
    assert jnp.allclose(out1, ref1, atol=1e-4, rtol=1e-4), (
        float(jnp.max(jnp.abs(out1 - ref1))))

    # --- Test 2: default fast path (bf16 streaming + bf16 output) -----------
    out2 = jax.block_until_ready(
        patch_embed_3d(x1, conv_weight, conv_bias, patch_size=patch_size))
    assert out2.dtype == jnp.bfloat16
    assert jnp.allclose(out2.astype(jnp.float32), ref1, atol=5e-2, rtol=5e-2), (
        float(jnp.max(jnp.abs(out2.astype(jnp.float32) - ref1))))

    # --- Test 3: unaligned video (spatial padding + tiny unaligned L=36) ----
    x2 = jax.random.normal(k_x2, (1, in_chans, 5, 14, 10), dtype=jnp.float32)
    out3 = jax.block_until_ready(
        patch_embed_3d(x2, conv_weight, conv_bias, patch_size=patch_size,
                       compute_dtype=jnp.float32))
    ref3 = jax.block_until_ready(
        patch_embed_3d_ref(x2, conv_weight, conv_bias, patch_size))
    assert out3.shape == ref3.shape, (out3.shape, ref3.shape)
    assert jnp.allclose(out3, ref3, atol=1e-4, rtol=1e-4), (
        float(jnp.max(jnp.abs(out3 - ref3))))

    # --- Test 4: larger aligned L (=4224): exercises the N==1 two-tile split
    # and a partial final L tile whose OOB columns must be dropped. ----------
    x3 = jax.random.normal(k_x3, (1, in_chans, 8, 132, 128), dtype=jnp.float32)
    out4 = jax.block_until_ready(
        patch_embed_3d(x3, conv_weight, conv_bias, patch_size=patch_size,
                       compute_dtype=jnp.float32))
    ref4 = jax.block_until_ready(
        patch_embed_3d_ref(x3, conv_weight, conv_bias, patch_size))
    assert out4.shape == ref4.shape, (out4.shape, ref4.shape)
    assert jnp.allclose(out4, ref4, atol=5e-4, rtol=5e-4), (
        float(jnp.max(jnp.abs(out4 - ref4))))

    print("KERNEL_OK")
</pallas_src>

<mosaic_0001>
module attributes {stable_mosaic.version = 11 : i64} {
  func.func @_patch_proj_kernel(%arg0: i32, %arg1: i32, %arg2: memref<1x96x64xf32, #tpu.memory_space<vmem>>, %arg3: memref<192x96xf32, #tpu.memory_space<vmem>>, %arg4: memref<192x1xf32, #tpu.memory_space<vmem>>, %arg5: memref<1x192x64xf32, #tpu.memory_space<vmem>>) attributes {dimension_semantics = [#tpu.dimension_semantics<parallel>, #tpu.dimension_semantics<parallel>], iteration_bounds = array<i64: 2, 1>, scalar_prefetch = 0 : i64, scratch_operands = 0 : i64, tpu.core_type = #tpu.core_type<tc>, window_params = [{transform_indices = @transform_0, window_bounds = array<i64: 1, 96, 64>}, {pipeline_mode = #tpu.pipeline_mode<synchronous>, transform_indices = @transform_1, window_bounds = array<i64: 192, 96>}, {pipeline_mode = #tpu.pipeline_mode<synchronous>, transform_indices = @transform_2, window_bounds = array<i64: 192, 1>}, {transform_indices = @transform_3, window_bounds = array<i64: 1, 192, 64>}]} {
    %c0 = arith.constant 0 : index
    %c0_0 = arith.constant 0 : index
    %0 = vector.load %arg3[%c0, %c0_0] : memref<192x96xf32, #tpu.memory_space<vmem>>, vector<192x96xf32>
    %c0_1 = arith.constant 0 : index
    %c0_2 = arith.constant 0 : index
    %c0_3 = arith.constant 0 : index
    %1 = vector.load %arg2[%c0_1, %c0_2, %c0_3] : memref<1x96x64xf32, #tpu.memory_space<vmem>>, vector<1x96x64xf32>
    %2 = vector.shape_cast %1 : vector<1x96x64xf32> to vector<96x64xf32>
    %cst = arith.constant dense<0.000000e+00> : vector<192x64xf32>
    %3 = tpu.matmul %0, %2, %cst {dimension_numbers = #tpu.dot_dimension_numbers<[1], [0], [0], [1], [0, 0, 1, 1], [], []>} : vector<192x96xf32>, vector<96x64xf32>, vector<192x64xf32> -> vector<192x64xf32>
    %c0_4 = arith.constant 0 : index
    %c0_5 = arith.constant 0 : index
    %4 = vector.load %arg4[%c0_4, %c0_5] : memref<192x1xf32, #tpu.memory_space<vmem>>, vector<192x1xf32>
    %5 = vector.broadcast %4 : vector<192x1xf32> to vector<192x64xf32>
    %6 = arith.addf %3, %5 : vector<192x64xf32>
    %c0_6 = arith.constant 0 : index
    %c0_7 = arith.constant 0 : index
    %c0_8 = arith.constant 0 : index
    %7 = vector.load %arg5[%c0_6, %c0_7, %c0_8] : memref<1x192x64xf32, #tpu.memory_space<vmem>>, vector<1x192x64xf32>
    %8 = vector.shape_cast %7 : vector<1x192x64xf32> to vector<192x64xf32>
    %9 = vector.shape_cast %6 : vector<192x64xf32> to vector<1x192x64xf32>
    tpu.vector_store %arg5[%c0_6, %c0_7, %c0_8], %9 {strides = array<i32>} : memref<1x192x64xf32, #tpu.memory_space<vmem>>, vector<1x192x64xf32>,
    return
  }
  func.func @transform_0(%arg0: i32, %arg1: i32) -> (i32, i32, i32) {
    %c0_i32 = arith.constant 0 : i32
    %c0_i32_0 = arith.constant 0 : i32
    return %arg0, %c0_i32, %arg1 : i32, i32, i32
  }
  func.func @transform_1(%arg0: i32, %arg1: i32) -> (i32, i32) {
    %c0_i32 = arith.constant 0 : i32
    %c0_i32_0 = arith.constant 0 : i32
    %c0_i32_1 = arith.constant 0 : i32
    return %c0_i32, %c0_i32_0 : i32, i32
  }
  func.func @transform_2(%arg0: i32, %arg1: i32) -> (i32, i32) {
    %c0_i32 = arith.constant 0 : i32
    %c0_i32_0 = arith.constant 0 : i32
    %c0_i32_1 = arith.constant 0 : i32
    return %c0_i32, %c0_i32_0 : i32, i32
  }
  func.func @transform_3(%arg0: i32, %arg1: i32) -> (i32, i32, i32) {
    %c0_i32 = arith.constant 0 : i32
    %c0_i32_0 = arith.constant 0 : i32
    return %arg0, %c0_i32, %arg1 : i32, i32, i32
  }
}

</mosaic_0001>

<bundles_post_ra>
// kernel: patch_embed_3d.1
= control target key start
LH: loop header
LB: loop body
LE: loop exit
PB: predicated region body
PF: predicated region fallthrough
CT: control target
= control target key end

     0   :  { %s987_s12 = smov 0   ;;  %s989_s13 = smov 0   ;;  %s1268_s0 = inlined_call_operand.vmem [shape: f32[2,96,64], index: 0, kind: input, shape index: {}]   ;;  %s1269_s1 = inlined_call_operand.vmem [shape: f32[192,96], index: 1, kind: input, shape index: {}]   ;;  %s1270_s2 = inlined_call_operand.vmem [shape: f32[192,1], index: 2, kind: input, shape index: {}]   ;;  %s1271_s3 = inlined_call_operand.vmem [shape: f32[2,192,64], index: 3, kind: output, shape index: {}]  }
   0x1   :  { %s991_s14 = smov 0  }
   0x2 LB: > { %s25_s15 = sadd.s32 1, %s960_s13  ;;  %p752_p0 = scmp.ge.s32.totalorder %s964_s14, 1  ;;  %s964_s14 = sphi %s991_s14, %s13_s14   ;;  %s960_s13 = sphi %s989_s13, %s1273_s13   ;;  %s956_s12 = sphi %s987_s12, %s1272_s12  }
   0x3   : > { %p27_p1 = scmp.ge.s32.totalorder %s25_s15, 2  ;;  %p156_p2 = scmp.lt.s32.totalorder %s964_s14, 3 }
   0x5   : > { %s1275_s15 = smov (%p27_p1, %s25_s15), 0  ;;  %p157_p3 = pnand %p752_p0, %p156_p2 }
   0x6   : > { %p186_p4 = scmp.lt.s32.totalorder (!%p157_p3), %s956_s12, 1  ;;  %v202_v0 = vld [vmem:[%s1269_s1] sm:$0xff] (!%p157_p3)  ;;  %vm382_vm0 = vcmask (!%p157_p3), 785408   ;;  %v966_v2 = vmov (!%p157_p3), 0   ;;  %v240_v3 = vld [vmem:[%s1270_s2 + $0x10] sm:$0xff] (!%p157_p3)  ;;  %v241_v14 = vld [vmem:[%s1270_s2 + $0x18] sm:$0xff] (!%p157_p3) }
   0x7   : > { %160 = sbr.rel (%p157_p3) target bundleno = 281 (0x119), region = 32  ;;  %v214_v1 = vld [vmem:[%s1269_s1 + $0x60] sm:$0xff] (!%p157_p3)  ;;  %841 = vmatprep.mubr.msk.f32.mxu0 (!%p157_p3), %vm382_vm0, %v202_v0  ;;  %941 = vset.pattern.permute.xlu1 (!%p157_p3), %v966_v2  ;;  %v239_v17 = vld [vmem:[%s1270_s2 + $0x8] sm:$0xff] (!%p157_p3)  ;;  %v245_v23 = vld [vmem:[%s1270_s2 + $0x38] sm:$0xff] (!%p157_p3)  ;;  %vm640_vm1 = vcmask (!%p157_p3), 523264  }
   0x8   : > { %859 = vmatprep.mubr.msk.f32.mxu1 (!%p157_p3), %vm382_vm0, %v214_v1  ;;  %940 = vset.pattern.permute.xlu0 (!%p157_p3), %v966_v2  ;;  %v238_v12 = vld [vmem:[%s1270_s2] sm:$0xff] (!%p157_p3)  ;;  %v243_v18 = vld [vmem:[%s1270_s2 + $0x28] sm:$0xff] (!%p157_p3)  ;;  %v244_v27 = vld [vmem:[%s1270_s2 + $0x30] sm:$0xff] (!%p157_p3) }
   0x9   : > { %274 = vperm.xlu1 (!%p157_p3), %941, %v240_v3   ;;  %264 = vperm.xlu0 (!%p157_p3), %940, %v238_v12   ;;  %v242_v22 = vld [vmem:[%s1270_s2 + $0x20] sm:$0xff] (!%p157_p3)  ;;  %v247_v28 = vld [vmem:[%s1270_s2 + $0x48] sm:$0xff] (!%p157_p3)  ;;  %v249_v31 = vld [vmem:[%s1270_s2 + $0x58] sm:$0xff] (!%p157_p3) }
   0xa   : > { %v246_v30 = vld [vmem:[%s1270_s2 + $0x40] sm:$0xff] (!%p157_p3)  ;;  %v248_v32 = vld [vmem:[%s1270_s2 + $0x50] sm:$0xff] (!%p157_p3)  ;;  %v251_v33 = vld [vmem:[%s1270_s2 + $0x68] sm:$0xff] (!%p157_p3) }
   0xb   : > { %v203_v34 = vld [vmem:[%s1269_s1 + $0x8] sm:$0xff] (!%p157_p3)  ;;  %v204_v36 = vld [vmem:[%s1269_s1 + $0x10] sm:$0xff] (!%p157_p3)  ;;  %v250_v38 = vld [vmem:[%s1270_s2 + $0x60] sm:$0xff] (!%p157_p3) }
   0xc   : > { %v215_v35 = vld [vmem:[%s1269_s1 + $0x68] sm:$0xff] (!%p157_p3)  ;;  %v216_v37 = vld [vmem:[%s1269_s1 + $0x70] sm:$0xff] (!%p157_p3)  ;;  %v253_v39 = vld [vmem:[%s1270_s2 + $0x78] sm:$0xff] (!%p157_p3) }
   0xd   : > { %279 = vperm.xlu1 (!%p157_p3), %941, %v241_v14   ;;  %269 = vperm.xlu0 (!%p157_p3), %940, %v239_v17   ;;  %v205_v40 = vld [vmem:[%s1269_s1 + $0x18] sm:$0xff] (!%p157_p3)  ;;  %v206_v42 = vld [vmem:[%s1269_s1 + $0x20] sm:$0xff] (!%p157_p3)  ;;  %v252_v44 = vld [vmem:[%s1270_s2 + $0x70] sm:$0xff] (!%p157_p3) }
   0xe   : > { %s1277_s12 = smov (!%p186_p4, %s956_s12), 1  ;;  %v217_v41 = vld [vmem:[%s1269_s1 + $0x78] sm:$0xff]  ;;  %v218_v43 = vld [vmem:[%s1269_s1 + $0x80] sm:$0xff]  ;;  %v255_v45 = vld [vmem:[%s1270_s2 + $0x88] sm:$0xff] }
   0xf   : > { %s913_s20 = smul.u32 96, %s1277_s12  ;;  %v207_v46 = vld [vmem:[%s1269_s1 + $0x28] sm:$0xff]  ;;  %v208_v48 = vld [vmem:[%s1269_s1 + $0x30] sm:$0xff]  ;;  %v254_v50 = vld [vmem:[%s1270_s2 + $0x80] sm:$0xff] }
  0x10   : > { %v219_v47 = vld [vmem:[%s1269_s1 + $0x88] sm:$0xff]  ;;  %v220_v49 = vld [vmem:[%s1269_s1 + $0x90] sm:$0xff]  ;;  %v257_v51 = vld [vmem:[%s1270_s2 + $0x98] sm:$0xff]  ;;  %s914_s24 = smul.u32 192, %s1277_s12 }
  0x11   : > { %s1019_s23 = scalar_lea.vmem %s1268_s0, %s913_s20  ;;  %289 = vperm.xlu1 %941, %v243_v18   ;;  %284 = vperm.xlu0 %940, %v242_v22   ;;  %v209_v52 = vld [vmem:[%s1269_s1 + $0x38] sm:$0xff]  ;;  %v210_v54 = vld [vmem:[%s1269_s1 + $0x40] sm:$0xff]  ;;  %v256_v56 = vld [vmem:[%s1270_s2 + $0x90] sm:$0xff] }
  0x12   : > { %v226_v4 = vld [vmem:[%s1019_s23] sm:$0xff]  ;;  %v227_v5 = vld [vmem:[%s1019_s23 + $0x8] sm:$0xff]  ;;  %v228_v6 = vld [vmem:[%s1019_s23 + $0x10] sm:$0xff]  ;;  %s1205_s27 = scalar_lea.vmem %s1271_s3, %s914_s24 }
  0x13   : > { %v877_v7 = vpack.c.bf16 %v227_v5, %v226_v4  ;;  %v229_v8 = vld [vmem:[%s1019_s23 + $0x18] sm:$0xff]  ;;  %v230_v10 = vld [vmem:[%s1019_s23 + $0x20] sm:$0xff]  ;;  %v231_v11 = vld [vmem:[%s1019_s23 + $0x28] sm:$0xff] }
  0x14   : > { %v881_v9 = vpack.c.bf16 %v229_v8, %v228_v6  ;;  %v885_v13 = vpack.c.bf16 %v231_v11, %v230_v10  ;;  %v232_v15 = vld [vmem:[%s1019_s23 + $0x30] sm:$0xff]  ;;  %v233_v16 = vld [vmem:[%s1019_s23 + $0x38] sm:$0xff]  ;;  %v234_v20 = vld [vmem:[%s1019_s23 + $0x40] sm:$0xff] }
  0x15   : > { %878 = vmatprep.subr.bf16.mxu0 %v877_v7  ;;  %901 = vmatprep.subr.bf16.mxu1 %v877_v7  ;;  %v889_v19 = vpack.c.bf16 %v233_v16, %v232_v15  ;;  %v235_v21 = vld [vmem:[%s1019_s23 + $0x48] sm:$0xff]  ;;  %v236_v25 = vld [vmem:[%s1019_s23 + $0x50] sm:$0xff]  ;;  %v237_v26 = vld [vmem:[%s1019_s23 + $0x58] sm:$0xff] }
  0x16   : > { %880 = vmatpush3.bf16.msra.mxu0 %v877_v7  ;;  %907 = vmatpush3.bf16.msra.mxu1 %v877_v7  ;;  %v893_v24 = vpack.c.bf16 %v235_v21, %v234_v20  ;;  %v897_v29 = vpack.c.bf16 %v237_v26, %v236_v25  ;;  %v221_v53 = vld [vmem:[%s1269_s1 + $0x98] sm:$0xff]  ;;  %v222_v55 = vld [vmem:[%s1269_s1 + $0xa0] sm:$0xff]  ;;  %v259_v57 = vld [vmem:[%s1270_s2 + $0xa8] sm:$0xff] }
  0x17   : > { %882 = vmatprep.subr.bf16.mxu0 %v881_v9  ;;  %902 = vmatprep.subr.bf16.mxu1 %v881_v9  ;;  %v211_v58 = vld [vmem:[%s1269_s1 + $0x48] sm:$0xff]  ;;  %v212_v60 = vld [vmem:[%s1269_s1 + $0x50] sm:$0xff]  ;;  %v258_v62 = vld [vmem:[%s1270_s2 + $0xa0] sm:$0xff] }
  0x18   : > { %299 = vperm.xlu1 %941, %v245_v23   ;;  %294 = vperm.xlu0 %940, %v244_v27   ;;  %v223_v59 = vld [vmem:[%s1269_s1 + $0xa8] sm:$0xff]  ;;  %v224_v61 = vld [vmem:[%s1269_s1 + $0xb0] sm:$0xff]  ;;  %v261_v63 = vld [vmem:[%s1270_s2 + $0xb8] sm:$0xff] }
  0x19   : > { %v213_v0 = vld [vmem:[%s1269_s1 + $0x58] sm:$0xff]  ;;  %v260_v2 = vld [vmem:[%s1270_s2 + $0xb0] sm:$0xff] }
  0x1a   : > { %884 = vmatpush3.bf16.msra.mxu0 %v881_v9  ;;  %908 = vmatpush3.bf16.msra.mxu1 %v881_v9  ;;  %v225_v1 = vld [vmem:[%s1269_s1 + $0xb8] sm:$0xff] }
  0x1b   : > { %886 = vmatprep.subr.bf16.mxu0 %v885_v13  ;;  %903 = vmatprep.subr.bf16.mxu1 %v885_v13 }
  0x1c   : > { %309 = vperm.xlu1 %941, %v247_v28   ;;  %304 = vperm.xlu0 %940, %v246_v30  }
  0x1e   : > { %888 = vmatpush3.bf16.msra.mxu0 %v885_v13  ;;  %909 = vmatpush3.bf16.msra.mxu1 %v885_v13 }
  0x1f   : > { %890 = vmatprep.subr.bf16.mxu0 %v889_v19  ;;  %904 = vmatprep.subr.bf16.mxu1 %v889_v19 }
  0x20   : > { %319 = vperm.xlu1 %941, %v249_v31   ;;  %314 = vperm.xlu0 %940, %v248_v32  }
  0x22   : > { %892 = vmatpush3.bf16.msra.mxu0 %v889_v19  ;;  %910 = vmatpush3.bf16.msra.mxu1 %v889_v19 }
  0x23   : > { %894 = vmatprep.subr.bf16.mxu0 %v893_v24  ;;  %905 = vmatprep.subr.bf16.mxu1 %v893_v24 }
  0x24   : > { %329 = vperm.xlu1 %941, %v251_v33   ;;  %324 = vperm.xlu0 %940, %v250_v38  }
  0x26   : > { %896 = vmatpush3.bf16.msra.mxu0 %v893_v24  ;;  %911 = vmatpush3.bf16.msra.mxu1 %v893_v24 }
  0x27   : > { %898 = vmatprep.subr.bf16.mxu0 %v897_v29  ;;  %906 = vmatprep.subr.bf16.mxu1 %v897_v29 }
  0x28   : > { %339 = vperm.xlu1 %941, %v253_v39   ;;  %334 = vperm.xlu0 %940, %v252_v44  }
  0x2a   : > { %900 = vmatpush3.bf16.msra.mxu0 %v897_v29  ;;  %912 = vmatpush3.bf16.msra.mxu1 %v897_v29 }
  0x2c   : > { %349 = vperm.xlu1 %941, %v255_v45   ;;  %344 = vperm.xlu0 %940, %v254_v50  }
  0x2d   : > { %842 = vmatmul.mubr.msk.f32.vlgmr.msra.gmra.mrb[0].mxu0 %vm382_vm0, %v203_v34  ;;  %860 = vmatmul.mubr.msk.f32.vlgmr.msra.gmra.mrb[0].mxu1 %vm382_vm0, %v215_v35 }
  0x2e   : > { %844 = vmatprep.mubr.msk.f32.mxu0 %vm382_vm0, %v204_v36  ;;  %862 = vmatprep.mubr.msk.f32.mxu1 %vm382_vm0, %v216_v37 }
  0x30   : > { %359 = vperm.xlu1 %941, %v257_v51   ;;  %354 = vperm.xlu0 %940, %v256_v56  }
  0x31   : > { %845 = vmatmul.mubr.msk.f32.gmra.mrb[2].mxu0 %vm382_vm0, %v205_v40  ;;  %863 = vmatmul.mubr.msk.f32.gmra.mrb[2].mxu1 %vm382_vm0, %v217_v41 }
  0x32   : > { %847 = vmatprep.mubr.msk.f32.mxu0 %vm382_vm0, %v206_v42  ;;  %865 = vmatprep.mubr.msk.f32.mxu1 %vm382_vm0, %v218_v43 }
  0x34   : > { %369 = vperm.xlu1 %941, %v259_v57   ;;  %364 = vperm.xlu0 %940, %v258_v62  }
  0x35   : > { %848 = vmatmul.mubr.msk.f32.gmra.mrb[4].mxu0 %vm382_vm0, %v207_v46  ;;  %866 = vmatmul.mubr.msk.f32.gmra.mrb[4].mxu1 %vm382_vm0, %v219_v47 }
  0x36   : > { %850 = vmatprep.mubr.msk.f32.mxu0 %vm382_vm0, %v208_v48  ;;  %868 = vmatprep.mubr.msk.f32.mxu1 %vm382_vm0, %v220_v49 }
  0x38   : > { %379 = vperm.xlu1 %941, %v261_v63   ;;  %374 = vperm.xlu0 %940, %v260_v2  }
  0x39   : > { %851 = vmatmul.mubr.msk.f32.gmra.mrb[6].mxu0 %vm382_vm0, %v209_v52  ;;  %869 = vmatmul.mubr.msk.f32.gmra.mrb[6].mxu1 %vm382_vm0, %v221_v53 }
  0x3a   : > { %853 = vmatprep.mubr.msk.f32.mxu0 %vm382_vm0, %v210_v54  ;;  %871 = vmatprep.mubr.msk.f32.mxu1 %vm382_vm0, %v222_v55 }
  0x3d   : > { %854 = vmatmul.mubr.msk.f32.gmra.mrb[8].mxu0 %vm382_vm0, %v211_v58  ;;  %872 = vmatmul.mubr.msk.f32.gmra.mrb[8].mxu1 %vm382_vm0, %v223_v59 }
  0x3e   : > { %856 = vmatprep.mubr.msk.f32.mxu0 %vm382_vm0, %v212_v60  ;;  %874 = vmatprep.mubr.msk.f32.mxu1 %vm382_vm0, %v224_v61 }
  0x41   : > { %857 = vmatmul.mubr.msk.f32.gmra.mrb[10].mxu0 %vm382_vm0, %v213_v0  ;;  %875 = vmatmul.mubr.msk.f32.gmra.mrb[10].mxu1 %vm382_vm0, %v225_v1 }
  0x88   : > { %v275_v3 = vpop.permute.xlu1 %274  ;;  %v265_v4 = vpop.permute.xlu0 %264 }
  0x8c   : > { %v280_v5 = vpop.permute.xlu1 %279  ;;  %v270_v6 = vpop.permute.xlu0 %269 }
  0x90   : > { %v290_v7 = vpop.permute.xlu1 %289  ;;  %v285_v8 = vpop.permute.xlu0 %284 }
  0x97   : > { %v300_v9 = vpop.permute.xlu1 %299  ;;  %v295_v10 = vpop.permute.xlu0 %294 }
  0x9b   : > { %v1193_v11 = vpop.permute.xlu1 %309  ;;  %v1195_v12 = vpop.permute.xlu0 %304 }
  0x9f   : > { %v1197_v13 = vpop.permute.xlu1 %319  ;;  %v1199_v14 = vpop.permute.xlu0 %314 }
  0xa3   : > { %v330_v15 = vpop.permute.xlu1 %329  ;;  %v325_v16 = vpop.permute.xlu0 %324 }
  0xa7   : > { %v340_v17 = vpop.permute.xlu1 %339  ;;  %v335_v18 = vpop.permute.xlu0 %334 }
  0xab   : > { %v350_v19 = vpop.permute.xlu1 %349  ;;  %v345_v20 = vpop.permute.xlu0 %344 }
  0xaf   : > { %v360_v29 = vpop.permute.xlu1 %359  ;;  %v355_v30 = vpop.permute.xlu0 %354 }
  0xb3   : > { %v370_v47 = vpop.permute.xlu1 %369  ;;  %v365_v48 = vpop.permute.xlu0 %364 }
  0xb7   : > { %v380_v1 = vpop.permute.xlu1 %379  ;;  %v375_v2 = vpop.permute.xlu0 %374 }
 0x100   : > { %v843_v21 = vpop.f32.mrb[0].mxu0  ;;  %v861_v22 = vpop.f32.mrb[0].mxu1 }
 0x101   : > { %v527_v23 = vadd.f32 %v843_v21, %v270_v6  ;;  %v587_v24 = vadd.f32 %v861_v22, %v330_v15  ;;  %v521_v25 = vpop.f32.mrb[1].mxu0  ;;  %v581_v26 = vpop.f32.mrb[1].mxu1 }
 0x102   : > { %v522_v27 = vadd.f32 %v521_v25, %v265_v4  ;;  %v582_v28 = vadd.f32 %v581_v26, %v325_v16 }
 0x103   : > { %642 = vst.msk [vmem:[%s1205_s27 + $0x8] sm:$0xff] %vm640_vm1, %v527_v23  ;;  %654 = vst.msk [vmem:[%s1205_s27 + $0x68] sm:$0xff] %vm640_vm1, %v587_v24 }
 0x104   : > { %641 = vst.msk [vmem:[%s1205_s27] sm:$0xff] %vm640_vm1, %v522_v27  ;;  %653 = vst.msk [vmem:[%s1205_s27 + $0x60] sm:$0xff] %vm640_vm1, %v582_v28  ;;  %v846_v31 = vpop.f32.mrb[2].mxu0  ;;  %v864_v32 = vpop.f32.mrb[2].mxu1 }
 0x105   : > { %v537_v33 = vadd.f32 %v846_v31, %v280_v5  ;;  %v597_v34 = vadd.f32 %v864_v32, %v340_v17  ;;  %v531_v35 = vpop.f32.mrb[3].mxu0  ;;  %v591_v36 = vpop.f32.mrb[3].mxu1 }
 0x106   : > { %v532_v37 = vadd.f32 %v531_v35, %v275_v3  ;;  %v592_v38 = vadd.f32 %v591_v36, %v335_v18 }
 0x107   : > { %644 = vst.msk [vmem:[%s1205_s27 + $0x18] sm:$0xff] %vm640_vm1, %v537_v33  ;;  %656 = vst.msk [vmem:[%s1205_s27 + $0x78] sm:$0xff] %vm640_vm1, %v597_v34 }
 0x108   : > { %643 = vst.msk [vmem:[%s1205_s27 + $0x10] sm:$0xff] %vm640_vm1, %v532_v37  ;;  %655 = vst.msk [vmem:[%s1205_s27 + $0x70] sm:$0xff] %vm640_vm1, %v592_v38  ;;  %v849_v39 = vpop.f32.mrb[4].mxu0  ;;  %v867_v40 = vpop.f32.mrb[4].mxu1 }
 0x109   : > { %v547_v41 = vadd.f32 %v849_v39, %v290_v7  ;;  %v607_v42 = vadd.f32 %v867_v40, %v350_v19  ;;  %v541_v43 = vpop.f32.mrb[5].mxu0  ;;  %v601_v44 = vpop.f32.mrb[5].mxu1 }
 0x10a   : > { %v542_v45 = vadd.f32 %v541_v43, %v285_v8  ;;  %v602_v46 = vadd.f32 %v601_v44, %v345_v20 }
 0x10b   : > { %646 = vst.msk [vmem:[%s1205_s27 + $0x28] sm:$0xff] %vm640_vm1, %v547_v41  ;;  %658 = vst.msk [vmem:[%s1205_s27 + $0x88] sm:$0xff] %vm640_vm1, %v607_v42 }
 0x10c   : > { %645 = vst.msk [vmem:[%s1205_s27 + $0x20] sm:$0xff] %vm640_vm1, %v542_v45  ;;  %657 = vst.msk [vmem:[%s1205_s27 + $0x80] sm:$0xff] %vm640_vm1, %v602_v46  ;;  %v852_v49 = vpop.f32.mrb[6].mxu0  ;;  %v870_v50 = vpop.f32.mrb[6].mxu1 }
 0x10d   : > { %v557_v51 = vadd.f32 %v852_v49, %v300_v9  ;;  %v617_v52 = vadd.f32 %v870_v50, %v360_v29  ;;  %v551_v53 = vpop.f32.mrb[7].mxu0  ;;  %v611_v54 = vpop.f32.mrb[7].mxu1 }
 0x10e   : > { %v552_v55 = vadd.f32 %v551_v53, %v295_v10  ;;  %v612_v56 = vadd.f32 %v611_v54, %v355_v30 }
 0x10f   : > { %648 = vst.msk [vmem:[%s1205_s27 + $0x38] sm:$0xff] %vm640_vm1, %v557_v51  ;;  %660 = vst.msk [vmem:[%s1205_s27 + $0x98] sm:$0xff] %vm640_vm1, %v617_v52 }
 0x110   : > { %647 = vst.msk [vmem:[%s1205_s27 + $0x30] sm:$0xff] %vm640_vm1, %v552_v55  ;;  %659 = vst.msk [vmem:[%s1205_s27 + $0x90] sm:$0xff] %vm640_vm1, %v612_v56  ;;  %v855_v57 = vpop.f32.mrb[8].mxu0  ;;  %v873_v58 = vpop.f32.mrb[8].mxu1 }
 0x111   : > { %v567_v59 = vadd.f32 %v855_v57, %v1193_v11  ;;  %v627_v60 = vadd.f32 %v873_v58, %v370_v47  ;;  %v561_v61 = vpop.f32.mrb[9].mxu0  ;;  %v621_v62 = vpop.f32.mrb[9].mxu1 }
 0x112   : > { %v562_v63 = vadd.f32 %v561_v61, %v1195_v12  ;;  %v622_v0 = vadd.f32 %v621_v62, %v365_v48 }
 0x113   : > { %650 = vst.msk [vmem:[%s1205_s27 + $0x48] sm:$0xff] %vm640_vm1, %v567_v59  ;;  %662 = vst.msk [vmem:[%s1205_s27 + $0xa8] sm:$0xff] %vm640_vm1, %v627_v60 }
 0x114   : > { %649 = vst.msk [vmem:[%s1205_s27 + $0x40] sm:$0xff] %vm640_vm1, %v562_v63  ;;  %661 = vst.msk [vmem:[%s1205_s27 + $0xa0] sm:$0xff] %vm640_vm1, %v622_v0  ;;  %v858_v3 = vpop.f32.mrb[10].mxu0  ;;  %v876_v4 = vpop.f32.mrb[10].mxu1 }
 0x115   : > { %v577_v5 = vadd.f32 %v858_v3, %v1197_v13  ;;  %v637_v6 = vadd.f32 %v876_v4, %v380_v1  ;;  %v571_v7 = vpop.f32.mrb[11].mxu0  ;;  %v631_v8 = vpop.f32.mrb[11].mxu1 }
 0x116   : > { %v572_v9 = vadd.f32 %v571_v7, %v1199_v14  ;;  %v632_v10 = vadd.f32 %v631_v8, %v375_v2 }
 0x117   : > { %652 = vst.msk [vmem:[%s1205_s27 + $0x58] sm:$0xff] %vm640_vm1, %v577_v5  ;;  %664 = vst.msk [vmem:[%s1205_s27 + $0xb8] sm:$0xff] %vm640_vm1, %v637_v6 }
 0x118   : > { %651 = vst.msk [vmem:[%s1205_s27 + $0x50] sm:$0xff] %vm640_vm1, %v572_v9  ;;  %663 = vst.msk [vmem:[%s1205_s27 + $0xb0] sm:$0xff] %vm640_vm1, %v632_v10 }
 0x119 PF: > { %s13_s14 = sadd.s32 1, %s964_s14   ;;  %s1272_s12 = smov %s960_s13 }
 0x11a   : > { %p10_p5 = scmp.ge.s32.totalorder %s13_s14, 4   ;;  %s1273_s13 = smov %s1275_s15 }
 0x11c   :  { %12 = sbr.rel (!%p10_p5) target bundleno = 2 (0x2), region = 62 }

</bundles_post_ra>
